<compile_context>
chip_gen: v7x
topology: tpu7x:2x2x1
jax: 0.10.0
libtpu: 0.0.40
codegen_flags: <defaults>
</compile_context>

<pallas_src>
import functools
import math

import jax
import jax.numpy as jnp
import numpy as np
from jax.experimental import pallas as pl
from jax.experimental.pallas import tpu as pltpu


# ----------------------------------------------------------------------------- kernel

def _self_attn_kernel(x_ref, pos_ref,
                      wqk_ref, bqk_ref,
                      wv_ref, bv_ref,
                      wo_ref, bo_ref,
                      g_ref, beta_ref,
                      o_ref,
                      *, nhead, seq_len):
    N, E = x_ref.shape                       # N = block_b * S tokens
    S = seq_len
    Bb = N // S
    H = nhead
    dh = E // H
    BH = Bb * H
    scale = 1.0 / math.sqrt(dh)
    cdt = wqk_ref.dtype                      # MXU compute dtype (f32 or bf16)

    x = x_ref[...]                           # (N, E) f32: residual / value input (tgt)
    qkin = (x + pos_ref[...]).astype(cdt)    # with_pos_embed(tgt, query_pos)
    xc = x.astype(cdt)

    # --- fused Q|K projection and V projection: wide K=E matmuls on the token slab ------
    qk = (jnp.dot(qkin, wqk_ref[...], preferred_element_type=jnp.float32)
          + bqk_ref[...]).astype(cdt)                                  # (N, 2E)
    v = (jnp.dot(xc, wv_ref[...], preferred_element_type=jnp.float32)
         + bv_ref[...]).astype(cdt)                                    # (N, E)

    # --- head split: only row-regroup reshapes + batched minor-2 transposes --------------
    # (batch-major, head-minor leading dim: index b*H + h)
    qkT = jnp.swapaxes(qk.reshape(Bb, S, 2 * E), 1, 2)                 # (Bb, 2E, S)
    vT = jnp.swapaxes(v.reshape(Bb, S, E), 1, 2)                       # (Bb, E, S)
    qT = qkT[:, :E, :].reshape(BH, dh, S)                              # q^T per (b, h)
    kT = qkT[:, E:, :].reshape(BH, dh, S)                              # k^T per (b, h)
    vT = vT.reshape(BH, dh, S)                                         # v^T per (b, h)
    qh = jnp.swapaxes(qT, 1, 2)                                        # (BH, S, dh)

    # --- attention, batched over (batch, head) in one leading dim ------------------------
    # s[b,q,k] = sum_d qh[b,q,d] * kT[b,d,k]   (standard batched matmul form)
    s = jax.lax.dot_general(qh, kT, (((2,), (1,)), ((0,), (0,))),
                            preferred_element_type=jnp.float32)        # (BH, S, S) f32
    s = s * scale
    s = s - jnp.max(s, axis=-1, keepdims=True)
    p = jnp.exp(s)
    p = p * pl.reciprocal(jnp.sum(p, axis=-1, keepdims=True), approx=True)
    # attn[b,q,d] = sum_k p[b,q,k] * vT[b,d,k]  (contract-last-dims batched form)
    attn = jax.lax.dot_general(p.astype(cdt), vT, (((2,), (2,)), ((0,), (0,))),
                               preferred_element_type=jnp.float32)     # (BH, S, dh) f32

    # --- merge heads back to (N, E) and run ONE wide output projection (K = E) -----------
    attnT = jnp.swapaxes(attn.astype(cdt), 1, 2).reshape(Bb, E, S)     # (Bb, E, S)
    attn2 = jnp.swapaxes(attnT, 1, 2).reshape(N, E)                    # (N, E)
    proj = jnp.dot(attn2, wo_ref[...], preferred_element_type=jnp.float32)

    # --- residual + LayerNorm (f32, eps = 1e-5) -------------------------------------------
    res = x + proj + bo_ref[...]
    mu = jnp.mean(res, axis=-1, keepdims=True)
    var = jnp.mean(jnp.square(res - mu), axis=-1, keepdims=True)
    out = (res - mu) * jax.lax.rsqrt(var + 1e-5) * g_ref[...] + beta_ref[...]
    o_ref[...] = out.astype(o_ref.dtype)


# ----------------------------------------------------------------------------- tiling policy

def _tpu_vmem_bytes():
    try:
        return int(pltpu.get_tpu_info().vmem_capacity_bytes)
    except Exception:
        return 64 << 20                        # conservative (v7x-class) fallback


def _step_vmem_bytes(bb, S, E, H):
    """Generous upper bound on the f32 working set of one grid step."""
    N = bb * S
    act = 14 * N * E + 2 * bb * H * S * S      # projections, relayouts, scores, LN temps
    io = 6 * N * E                             # double-buffered x / pos / out blocks
    w = 8 * E * E + 16 * E                     # weights + biases
    return 4 * (act + io + w)


def _choose_block_b(B, S, E, H, vmem_cap):
    """Largest batch block that divides B, keeps the block layout legal ((bb*S)%8==0 or
    full), fits the per-step budget, and on 64 MiB parts (v7x) keeps >=2 parallel steps."""
    small_vmem = vmem_cap <= (64 << 20)
    budget = (20 << 20) if small_vmem else (40 << 20)

    def layout_ok(c):
        return ((c * S) % 8 == 0) or (c == B)

    best = None
    for cand in range(1, B + 1):
        if B % cand or not layout_ok(cand):
            continue
        if small_vmem and B >= 2 and (B // cand) < 2:
            continue
        if _step_vmem_bytes(cand, S, E, H) <= budget:
            best = cand
    if best is None:
        best = next((c for c in range(1, B + 1) if B % c == 0 and layout_ok(c)), B)
    return best


def _vmem_limit_bytes(bb, S, E, H, vmem_cap):
    est = _step_vmem_bytes(bb, S, E, H)
    if vmem_cap >= (100 << 20):                # 128 MiB parts (v5e / v6e)
        cap = 100 << 20
    else:                                      # v7x (64 MiB / TC) or unknown
        cap = min(vmem_cap, 64 << 20)
    return int(min(cap, max(32 << 20, 2 * est)))


# ----------------------------------------------------------------------------- wrapper

def _prepare_params(params, use_bf16_mxu):
    """Pre-transpose / fuse the weights once in the wrapper (no in-kernel .T)."""
    wdt = jnp.bfloat16 if use_bf16_mxu else jnp.float32
    # PyTorch Linear computes y = x @ W.T + b  ->  pass W.T = (E_in, E_out).
    wqk = jnp.concatenate([params["wq"].T, params["wk"].T], axis=1).astype(wdt)      # (E, 2E)
    bqk = jnp.concatenate([params["bq"], params["bk"]], axis=1).astype(jnp.float32)  # (1, 2E)
    return dict(
        wqk=wqk, bqk=bqk,
        wv=params["wv"].T.astype(wdt), bv=params["bv"].astype(jnp.float32),
        wo=params["wo"].T.astype(wdt), bo=params["bo"].astype(jnp.float32),
        g=params["ln_g"].astype(jnp.float32), beta=params["ln_b"].astype(jnp.float32))


def self_attention_layer(tgt, query_pos, params, nhead, *,
                         use_bf16_mxu=True, block_b=None):
    """tgt, query_pos: (S, B, E) fp32 (PyTorch seq-first convention). Returns (S, B, E)."""
    S, B, E = tgt.shape
    assert query_pos.shape == (S, B, E)
    assert E % nhead == 0, "d_model must be divisible by nhead"

    p = _prepare_params(params, use_bf16_mxu)

    # nn.MultiheadAttention is seq-first; flatten to a batch-major (B*S, E) token slab
    # so the kernel needs no in-kernel flatten for the projections.
    x2 = jnp.transpose(tgt, (1, 0, 2)).reshape(B * S, E).astype(jnp.float32)
    pos2 = jnp.transpose(query_pos, (1, 0, 2)).reshape(B * S, E).astype(jnp.float32)

    vmem_cap = _tpu_vmem_bytes()
    bb = block_b if block_b is not None else _choose_block_b(B, S, E, nhead, vmem_cap)
    assert B % bb == 0, "block_b must divide the batch size"
    grid = (B // bb,)
    rows = bb * S

    cparams = pltpu.CompilerParams(
        dimension_semantics=("parallel",),
        vmem_limit_bytes=_vmem_limit_bytes(bb, S, E, nhead, vmem_cap))

    in_specs = [
        pl.BlockSpec((rows, E), lambda i: (i, 0)),      # x   (tokens, E) residual / value
        pl.BlockSpec((rows, E), lambda i: (i, 0)),      # query_pos
        pl.BlockSpec((E, 2 * E), lambda i: (0, 0)),     # fused wq|wk (pre-transposed)
        pl.BlockSpec((1, 2 * E), lambda i: (0, 0)),     # fused bq|bk
        pl.BlockSpec((E, E), lambda i: (0, 0)),         # wv (pre-transposed)
        pl.BlockSpec((1, E), lambda i: (0, 0)),         # bv
        pl.BlockSpec((E, E), lambda i: (0, 0)),         # wo (pre-transposed)
        pl.BlockSpec((1, E), lambda i: (0, 0)),         # bo
        pl.BlockSpec((1, E), lambda i: (0, 0)),         # LayerNorm gamma
        pl.BlockSpec((1, E), lambda i: (0, 0)),         # LayerNorm beta
    ]

    kern = functools.partial(_self_attn_kernel, nhead=nhead, seq_len=S)
    out = pl.pallas_call(
        kern,
        out_shape=jax.ShapeDtypeStruct((B * S, E), tgt.dtype),
        grid=grid,
        in_specs=in_specs,
        out_specs=pl.BlockSpec((rows, E), lambda i: (i, 0)),
        compiler_params=cparams,
    )(x2, pos2, p["wqk"], p["bqk"], p["wv"], p["bv"], p["wo"], p["bo"], p["g"], p["beta"])

    return jnp.transpose(out.reshape(B, S, E), (1, 0, 2))   # back to (S, B, E)


# ----------------------------------------------------------------------------- init / reference

def init_params(key, d_model):
    """Deterministic synthetic init matching nn.MultiheadAttention + _reset_parameters:
       in_proj_weight (3E,E) xavier_uniform, out_proj.weight (E,E) xavier_uniform,
       biases zero, LayerNorm gamma=1 beta=0."""
    E = d_model
    k1, k2 = jax.random.split(key)
    bound_in = math.sqrt(6.0 / (3 * E + E))
    in_proj = jax.random.uniform(k1, (3 * E, E), jnp.float32, -bound_in, bound_in)
    bound_out = math.sqrt(6.0 / (E + E))
    wo = jax.random.uniform(k2, (E, E), jnp.float32, -bound_out, bound_out)
    return {
        "wq": in_proj[0:E],
        "wk": in_proj[E:2 * E],
        "wv": in_proj[2 * E:3 * E],
        "bq": jnp.zeros((1, E), jnp.float32),
        "bk": jnp.zeros((1, E), jnp.float32),
        "bv": jnp.zeros((1, E), jnp.float32),
        "wo": wo,
        "bo": jnp.zeros((1, E), jnp.float32),
        "ln_g": jnp.ones((1, E), jnp.float32),
        "ln_b": jnp.zeros((1, E), jnp.float32),
    }


def reference(tgt, pos, params, nhead):
    """Pure-JAX reference of the same forward pass (sanity check)."""
    S, B, E = tgt.shape
    dh = E // nhead
    x = jnp.transpose(tgt, (1, 0, 2))
    p = jnp.transpose(pos, (1, 0, 2))
    qk_in = x + p
    q = qk_in @ params["wq"].T + params["bq"]
    k = qk_in @ params["wk"].T + params["bk"]
    v = x @ params["wv"].T + params["bv"]
    q = q.reshape(B, S, nhead, dh).transpose(0, 2, 1, 3) / math.sqrt(dh)
    k = k.reshape(B, S, nhead, dh).transpose(0, 2, 1, 3)
    v = v.reshape(B, S, nhead, dh).transpose(0, 2, 1, 3)
    a = jax.nn.softmax(q @ k.transpose(0, 1, 3, 2), axis=-1)
    o = (a @ v).transpose(0, 2, 1, 3).reshape(B, S, E)
    o = o @ params["wo"].T + params["bo"]
    res = x + o
    mu = res.mean(-1, keepdims=True)
    var = ((res - mu) ** 2).mean(-1, keepdims=True)
    out = (res - mu) / jnp.sqrt(var + 1e-5) * params["ln_g"] + params["ln_b"]
    return out.transpose(1, 0, 2)


# ----------------------------------------------------------------------------- demo

if __name__ == "__main__":
    S, B, E, H = 8, 2, 32, 4   # seq, batch, d_model, nhead  (dh = 8)
    key = jax.random.PRNGKey(0)
    k_x, k_p, k_w = jax.random.split(key, 3)
    tgt = jax.random.normal(k_x, (S, B, E), jnp.float32)
    query_pos = jax.random.normal(k_p, (S, B, E), jnp.float32)
    params = init_params(k_w, E)

    ref = reference(tgt, query_pos, params, H)

    # f32 operands to the MXU -> tighter sanity check.
    out_f32 = jax.block_until_ready(
        self_attention_layer(tgt, query_pos, params, H, use_bf16_mxu=False))
    np.testing.assert_allclose(np.asarray(out_f32), np.asarray(ref), rtol=5e-2, atol=5e-2)

    # default fast path: bf16 operands to the MXU, f32 accumulation / softmax / LayerNorm.
    out_bf16 = jax.block_until_ready(
        self_attention_layer(tgt, query_pos, params, H, use_bf16_mxu=True))
    np.testing.assert_allclose(np.asarray(out_bf16), np.asarray(ref), rtol=1e-1, atol=3e-1)

    print("KERNEL_OK")
</pallas_src>

<mosaic_0001>
module attributes {stable_mosaic.version = 11 : i64} {
  func.func @_self_attn_kernel(%arg0: i32, %arg1: memref<8x32xf32, #tpu.memory_space<vmem>>, %arg2: memref<8x32xf32, #tpu.memory_space<vmem>>, %arg3: memref<32x64xf32, #tpu.memory_space<vmem>>, %arg4: memref<1x64xf32, #tpu.memory_space<vmem>>, %arg5: memref<32x32xf32, #tpu.memory_space<vmem>>, %arg6: memref<1x32xf32, #tpu.memory_space<vmem>>, %arg7: memref<32x32xf32, #tpu.memory_space<vmem>>, %arg8: memref<1x32xf32, #tpu.memory_space<vmem>>, %arg9: memref<1x32xf32, #tpu.memory_space<vmem>>, %arg10: memref<1x32xf32, #tpu.memory_space<vmem>>, %arg11: memref<8x32xf32, #tpu.memory_space<vmem>>) attributes {dimension_semantics = [#tpu.dimension_semantics<parallel>], iteration_bounds = array<i64: 2>, scalar_prefetch = 0 : i64, scratch_operands = 0 : i64, tpu.core_type = #tpu.core_type<tc>, window_params = [{transform_indices = @transform_0, window_bounds = array<i64: 8, 32>}, {transform_indices = @transform_1, window_bounds = array<i64: 8, 32>}, {pipeline_mode = #tpu.pipeline_mode<synchronous>, transform_indices = @transform_2, window_bounds = array<i64: 32, 64>}, {pipeline_mode = #tpu.pipeline_mode<synchronous>, transform_indices = @transform_3, window_bounds = array<i64: 1, 64>}, {pipeline_mode = #tpu.pipeline_mode<synchronous>, transform_indices = @transform_4, window_bounds = array<i64: 32, 32>}, {pipeline_mode = #tpu.pipeline_mode<synchronous>, transform_indices = @transform_5, window_bounds = array<i64: 1, 32>}, {pipeline_mode = #tpu.pipeline_mode<synchronous>, transform_indices = @transform_6, window_bounds = array<i64: 32, 32>}, {pipeline_mode = #tpu.pipeline_mode<synchronous>, transform_indices = @transform_7, window_bounds = array<i64: 1, 32>}, {pipeline_mode = #tpu.pipeline_mode<synchronous>, transform_indices = @transform_8, window_bounds = array<i64: 1, 32>}, {pipeline_mode = #tpu.pipeline_mode<synchronous>, transform_indices = @transform_9, window_bounds = array<i64: 1, 32>}, {transform_indices = @transform_10, window_bounds = array<i64: 8, 32>}]} {
    %c0 = arith.constant 0 : index
    %c0_0 = arith.constant 0 : index
    %0 = vector.load %arg1[%c0, %c0_0] : memref<8x32xf32, #tpu.memory_space<vmem>>, vector<8x32xf32>
    %c0_1 = arith.constant 0 : index
    %c0_2 = arith.constant 0 : index
    %1 = vector.load %arg2[%c0_1, %c0_2] : memref<8x32xf32, #tpu.memory_space<vmem>>, vector<8x32xf32>
    %2 = arith.addf %0, %1 : vector<8x32xf32>
    %c0_3 = arith.constant 0 : index
    %c0_4 = arith.constant 0 : index
    %3 = vector.load %arg3[%c0_3, %c0_4] : memref<32x64xf32, #tpu.memory_space<vmem>>, vector<32x64xf32>
    %cst = arith.constant dense<0.000000e+00> : vector<8x64xf32>
    %4 = tpu.matmul %2, %3, %cst {dimension_numbers = #tpu.dot_dimension_numbers<[1], [0], [0], [1], [0, 0, 1, 1], [], []>} : vector<8x32xf32>, vector<32x64xf32>, vector<8x64xf32> -> vector<8x64xf32>
    %c0_5 = arith.constant 0 : index
    %c0_6 = arith.constant 0 : index
    %5 = vector.load %arg4[%c0_5, %c0_6] : memref<1x64xf32, #tpu.memory_space<vmem>>, vector<1x64xf32>
    %6 = vector.broadcast %5 : vector<1x64xf32> to vector<8x64xf32>
    %7 = arith.addf %4, %6 : vector<8x64xf32>
    %c0_7 = arith.constant 0 : index
    %c0_8 = arith.constant 0 : index
    %8 = vector.load %arg5[%c0_7, %c0_8] : memref<32x32xf32, #tpu.memory_space<vmem>>, vector<32x32xf32>
    %cst_9 = arith.constant dense<0.000000e+00> : vector<8x32xf32>
    %9 = tpu.matmul %0, %8, %cst_9 {dimension_numbers = #tpu.dot_dimension_numbers<[1], [0], [0], [1], [0, 0, 1, 1], [], []>} : vector<8x32xf32>, vector<32x32xf32>, vector<8x32xf32> -> vector<8x32xf32>
    %c0_10 = arith.constant 0 : index
    %c0_11 = arith.constant 0 : index
    %10 = vector.load %arg6[%c0_10, %c0_11] : memref<1x32xf32, #tpu.memory_space<vmem>>, vector<1x32xf32>
    %11 = vector.broadcast %10 : vector<1x32xf32> to vector<8x32xf32>
    %12 = arith.addf %9, %11 : vector<8x32xf32>
    %13 = vector.shape_cast %7 : vector<8x64xf32> to vector<1x8x64xf32>
    %14 = tpu.transpose %13, [0, 2, 1] : vector<1x8x64xf32> -> vector<1x64x8xf32>
    %15 = vector.shape_cast %12 : vector<8x32xf32> to vector<1x8x32xf32>
    %16 = tpu.transpose %15, [0, 2, 1] : vector<1x8x32xf32> -> vector<1x32x8xf32>
    %17 = vector.extract_strided_slice %14 {offsets = [0, 0, 0], sizes = [1, 32, 8], strides = [1, 1, 1]} : vector<1x64x8xf32> to vector<1x32x8xf32>
    %18 = vector.shape_cast %17 : vector<1x32x8xf32> to vector<4x8x8xf32>
    %19 = vector.extract_strided_slice %14 {offsets = [0, 32, 0], sizes = [1, 32, 8], strides = [1, 1, 1]} : vector<1x64x8xf32> to vector<1x32x8xf32>
    %20 = vector.shape_cast %19 : vector<1x32x8xf32> to vector<4x8x8xf32>
    %21 = vector.shape_cast %16 : vector<1x32x8xf32> to vector<4x8x8xf32>
    %22 = tpu.transpose %18, [0, 2, 1] : vector<4x8x8xf32> -> vector<4x8x8xf32>
    %cst_12 = arith.constant dense<0.000000e+00> : vector<4x8x8xf32>
    %23 = tpu.matmul %22, %20, %cst_12 {dimension_numbers = #tpu.dot_dimension_numbers<[2], [1], [1], [2], [0, 0, 0, 1, 1, 2], [0], [0]>} : vector<4x8x8xf32>, vector<4x8x8xf32>, vector<4x8x8xf32> -> vector<4x8x8xf32>
    %cst_13 = arith.constant 0.353553385 : f32
    %24 = vector.broadcast %cst_13 : f32 to vector<4x8x8xf32>
    %25 = arith.mulf %23, %24 : vector<4x8x8xf32>
    %cst_14 = arith.constant dense<0xFF800000> : vector<4x8xf32>
    %26 = vector.multi_reduction <maximumf>, %25, %cst_14 [2] : vector<4x8x8xf32> to vector<4x8xf32>
    %27 = vector.shape_cast %26 : vector<4x8xf32> to vector<4x8x1xf32>
    %28 = vector.broadcast %27 : vector<4x8x1xf32> to vector<4x8x8xf32>
    %29 = arith.subf %25, %28 : vector<4x8x8xf32>
    %30 = math.exp %29 : vector<4x8x8xf32>
    %cst_15 = arith.constant dense<0.000000e+00> : vector<4x8xf32>
    %31 = vector.multi_reduction <add>, %30, %cst_15 [2] : vector<4x8x8xf32> to vector<4x8xf32>
    %32 = vector.shape_cast %31 : vector<4x8xf32> to vector<4x8x1xf32>
    %33 = tpu.reciprocal %32 {approx = true} : vector<4x8x1xf32> -> vector<4x8x1xf32>
    %34 = vector.broadcast %33 : vector<4x8x1xf32> to vector<4x8x8xf32>
    %35 = arith.mulf %30, %34 : vector<4x8x8xf32>
    %cst_16 = arith.constant dense<0.000000e+00> : vector<4x8x8xf32>
    %36 = tpu.matmul %35, %21, %cst_16 {dimension_numbers = #tpu.dot_dimension_numbers<[2], [2], [1], [1], [0, 0, 0, 1, 1, 1], [0], [0]>} : vector<4x8x8xf32>, vector<4x8x8xf32>, vector<4x8x8xf32> -> vector<4x8x8xf32>
    %37 = tpu.transpose %36, [0, 2, 1] : vector<4x8x8xf32> -> vector<4x8x8xf32>
    %38 = vector.shape_cast %37 : vector<4x8x8xf32> to vector<1x32x8xf32>
    %39 = tpu.transpose %38, [0, 2, 1] : vector<1x32x8xf32> -> vector<1x8x32xf32>
    %40 = vector.shape_cast %39 : vector<1x8x32xf32> to vector<8x32xf32>
    %c0_17 = arith.constant 0 : index
    %c0_18 = arith.constant 0 : index
    %41 = vector.load %arg7[%c0_17, %c0_18] : memref<32x32xf32, #tpu.memory_space<vmem>>, vector<32x32xf32>
    %cst_19 = arith.constant dense<0.000000e+00> : vector<8x32xf32>
    %42 = tpu.matmul %40, %41, %cst_19 {dimension_numbers = #tpu.dot_dimension_numbers<[1], [0], [0], [1], [0, 0, 1, 1], [], []>} : vector<8x32xf32>, vector<32x32xf32>, vector<8x32xf32> -> vector<8x32xf32>
    %43 = arith.addf %0, %42 : vector<8x32xf32>
    %c0_20 = arith.constant 0 : index
    %c0_21 = arith.constant 0 : index
    %44 = vector.load %arg8[%c0_20, %c0_21] : memref<1x32xf32, #tpu.memory_space<vmem>>, vector<1x32xf32>
    %45 = vector.broadcast %44 : vector<1x32xf32> to vector<8x32xf32>
    %46 = arith.addf %43, %45 : vector<8x32xf32>
    %cst_22 = arith.constant dense<0.000000e+00> : vector<8xf32>
    %47 = vector.multi_reduction <add>, %46, %cst_22 [1] : vector<8x32xf32> to vector<8xf32>
    %48 = vector.shape_cast %47 : vector<8xf32> to vector<8x1xf32>
    %cst_23 = arith.constant 3.200000e+01 : f32
    %49 = vector.broadcast %cst_23 : f32 to vector<8x1xf32>
    %50 = arith.divf %48, %49 : vector<8x1xf32>
    %51 = vector.broadcast %50 : vector<8x1xf32> to vector<8x32xf32>
    %52 = arith.subf %46, %51 : vector<8x32xf32>
    %53 = arith.mulf %52, %52 : vector<8x32xf32>
    %cst_24 = arith.constant dense<0.000000e+00> : vector<8xf32>
    %54 = vector.multi_reduction <add>, %53, %cst_24 [1] : vector<8x32xf32> to vector<8xf32>
    %55 = vector.shape_cast %54 : vector<8xf32> to vector<8x1xf32>
    %cst_25 = arith.constant 3.200000e+01 : f32
    %56 = vector.broadcast %cst_25 : f32 to vector<8x1xf32>
    %57 = arith.divf %55, %56 : vector<8x1xf32>
    %58 = vector.broadcast %50 : vector<8x1xf32> to vector<8x32xf32>
    %59 = arith.subf %46, %58 : vector<8x32xf32>
    %cst_26 = arith.constant 9.99999974E-6 : f32
    %60 = vector.broadcast %cst_26 : f32 to vector<8x1xf32>
    %61 = arith.addf %57, %60 : vector<8x1xf32>
    %62 = math.rsqrt %61 : vector<8x1xf32>
    %63 = vector.broadcast %62 : vector<8x1xf32> to vector<8x32xf32>
    %64 = arith.mulf %59, %63 : vector<8x32xf32>
    %c0_27 = arith.constant 0 : index
    %c0_28 = arith.constant 0 : index
    %65 = vector.load %arg9[%c0_27, %c0_28] : memref<1x32xf32, #tpu.memory_space<vmem>>, vector<1x32xf32>
    %66 = vector.broadcast %65 : vector<1x32xf32> to vector<8x32xf32>
    %67 = arith.mulf %64, %66 : vector<8x32xf32>
    %c0_29 = arith.constant 0 : index
    %c0_30 = arith.constant 0 : index
    %68 = vector.load %arg10[%c0_29, %c0_30] : memref<1x32xf32, #tpu.memory_space<vmem>>, vector<1x32xf32>
    %69 = vector.broadcast %68 : vector<1x32xf32> to vector<8x32xf32>
    %70 = arith.addf %67, %69 : vector<8x32xf32>
    %c0_31 = arith.constant 0 : index
    %c0_32 = arith.constant 0 : index
    %71 = vector.load %arg11[%c0_31, %c0_32] : memref<8x32xf32, #tpu.memory_space<vmem>>, vector<8x32xf32>
    tpu.vector_store %arg11[%c0_31, %c0_32], %70 {strides = array<i32>} : memref<8x32xf32, #tpu.memory_space<vmem>>, vector<8x32xf32>,
    return
  }
  func.func @transform_0(%arg0: i32) -> (i32, i32) {
    %c0_i32 = arith.constant 0 : i32
    %c0_i32_0 = arith.constant 0 : i32
    return %arg0, %c0_i32 : i32, i32
  }
  func.func @transform_1(%arg0: i32) -> (i32, i32) {
    %c0_i32 = arith.constant 0 : i32
    %c0_i32_0 = arith.constant 0 : i32
    return %arg0, %c0_i32 : i32, i32
  }
  func.func @transform_2(%arg0: i32) -> (i32, i32) {
    %c0_i32 = arith.constant 0 : i32
    %c0_i32_0 = arith.constant 0 : i32
    %c0_i32_1 = arith.constant 0 : i32
    return %c0_i32, %c0_i32_0 : i32, i32
  }
  func.func @transform_3(%arg0: i32) -> (i32, i32) {
    %c0_i32 = arith.constant 0 : i32
    %c0_i32_0 = arith.constant 0 : i32
    %c0_i32_1 = arith.constant 0 : i32
    return %c0_i32, %c0_i32_0 : i32, i32
  }
  func.func @transform_4(%arg0: i32) -> (i32, i32) {
    %c0_i32 = arith.constant 0 : i32
    %c0_i32_0 = arith.constant 0 : i32
    %c0_i32_1 = arith.constant 0 : i32
    return %c0_i32, %c0_i32_0 : i32, i32
  }
  func.func @transform_5(%arg0: i32) -> (i32, i32) {
    %c0_i32 = arith.constant 0 : i32
    %c0_i32_0 = arith.constant 0 : i32
    %c0_i32_1 = arith.constant 0 : i32
    return %c0_i32, %c0_i32_0 : i32, i32
  }
  func.func @transform_6(%arg0: i32) -> (i32, i32) {
    %c0_i32 = arith.constant 0 : i32
    %c0_i32_0 = arith.constant 0 : i32
    %c0_i32_1 = arith.constant 0 : i32
    return %c0_i32, %c0_i32_0 : i32, i32
  }
  func.func @transform_7(%arg0: i32) -> (i32, i32) {
    %c0_i32 = arith.constant 0 : i32
    %c0_i32_0 = arith.constant 0 : i32
    %c0_i32_1 = arith.constant 0 : i32
    return %c0_i32, %c0_i32_0 : i32, i32
  }
  func.func @transform_8(%arg0: i32) -> (i32, i32) {
    %c0_i32 = arith.constant 0 : i32
    %c0_i32_0 = arith.constant 0 : i32
    %c0_i32_1 = arith.constant 0 : i32
    return %c0_i32, %c0_i32_0 : i32, i32
  }
  func.func @transform_9(%arg0: i32) -> (i32, i32) {
    %c0_i32 = arith.constant 0 : i32
    %c0_i32_0 = arith.constant 0 : i32
    %c0_i32_1 = arith.constant 0 : i32
    return %c0_i32, %c0_i32_0 : i32, i32
  }
  func.func @transform_10(%arg0: i32) -> (i32, i32) {
    %c0_i32 = arith.constant 0 : i32
    %c0_i32_0 = arith.constant 0 : i32
    return %arg0, %c0_i32 : i32, i32
  }
}

</mosaic_0001>

<bundles_post_ra>
// kernel: tpu_custom_call.1
= control target key start
LH: loop header
LB: loop body
LE: loop exit
PB: predicated region body
PF: predicated region fallthrough
CT: control target
= control target key end

     0   :  { %s2821_s0 = inlined_call_operand.hbm [shape: f32[16,32], index: 0, kind: input, shape index: {}]   ;;  %s2822_s1 = inlined_call_operand.hbm [shape: f32[16,32], index: 1, kind: input, shape index: {}]   ;;  %s2823_s2 = inlined_call_operand.hbm [shape: f32[32,64], index: 2, kind: input, shape index: {}]   ;;  %s2824_s3 = inlined_call_operand.vmem [shape: f32[1,64], index: 3, kind: input, shape index: {}]   ;;  %s2825_s4 = inlined_call_operand.hbm [shape: f32[32,32], index: 4, kind: input, shape index: {}]   ;;  %s2826_s5 = inlined_call_operand.vmem [shape: f32[1,32], index: 5, kind: input, shape index: {}]   ;;  %s2827_s6 = inlined_call_operand.hbm [shape: f32[32,32], index: 6, kind: input, shape index: {}]   ;;  %s2828_s7 = inlined_call_operand.vmem [shape: f32[1,32], index: 7, kind: input, shape index: {}]   ;;  %s2829_s8 = inlined_call_operand.vmem [shape: f32[1,32], index: 8, kind: input, shape index: {}]   ;;  %s2830_s9 = inlined_call_operand.vmem [shape: f32[1,32], index: 9, kind: input, shape index: {}]   ;;  %s2831_s10 = inlined_call_operand.hbm [shape: f32[16,32], index: 10, kind: output, shape index: {}]  }
   0x1   :  { %2839 = sst [smem:[#allocation19_spill]] %s2823_s2 }
   0x2   :  { %2840 = sst [smem:[#allocation20_spill]] %s2825_s4 }
   0x3   :  { %2841 = sst [smem:[#allocation21_spill]] %s2827_s6 }
   0x4   :  { %2842 = sst [smem:[#allocation22_spill]] %s2830_s9 }
   0x5   :  { %2843 = sst [smem:[#allocation23_spill]] %s2831_s10 }
   0x6   :  { %15 = vsyncpa [#allocation3], 0 }
   0x7   :  { %17 = vsyncpa [#allocation3 + $0x1], 0 }
   0x8   :  { %18 = vsyncpa [#allocation6], 0 }
   0x9   :  { %20 = vsyncpa [#allocation6 + $0x1], 0 }
   0xa   :  { %21 = vsyncpa [#allocation9], 0 }
   0xb   :  { %22 = vsyncpa [#allocation4], 0 }
   0xc   :  { %24 = vsyncpa [#allocation4 + $0x1], 0  ;;  %s2434_s13 = smov 0   ;;  %s2436_s14 = smov 0  }
   0xd   :  { %s2438_s15 = smov 0   ;;  %s2440_s16 = smov 0  }
   0xe LB: > { %2844 = sst [smem:[#allocation17_spill]] %s2354_s13  ;;  %s2455_s17 = sadd.s32 4294967295, %s2366_s16   ;;  %s2366_s16 = sphi %s2440_s16, %s2874_s16   ;;  %s2362_s15 = sphi %s2438_s15, %s2873_s15   ;;  %s2358_s14 = sphi %s2436_s14, %s2872_s14   ;;  %s2354_s13 = sphi %s2434_s13, %s2871_s13  }
   0xf   : > { %s1876_s18 = sadd.s32 4294967294, %s2366_s16   ;;  %p50_p0 = scmp.ne.s32.totalorder %s2358_s14, %s2354_s13 }
  0x10   : > { %p2832_p1 = scmp.eq.s32.totalorder %s2455_s17, 0  ;;  %p274_p3 = scmp.eq.s32.totalorder %s1876_s18, 1 }
  0x11   : > { %p1877_p5 = scmp.ge.s32.totalorder %s2366_s16, 1  ;;  %p281_p7 = scmp.lt.s32.totalorder %s2366_s16, 3 }
  0x12   : > { %p2464_p4 = por %p2832_p1, %p50_p0  ;;  %p2469_p6 = por %p274_p3, %p50_p0 }
  0x13   : > { %p2474_p8 = pnand %p1877_p5, %p281_p7  ;;  %s2368_s22 = smov [#allocation7]  }
  0x14   : > { %s2845_s19 = scalar_select %p2464_p4, 1, 0 }
  0x15   : > { %s2846_s20 = scalar_select %p2469_p6, 1, 0 }
  0x16   : > { %s2848_s21 = scalar_select %p2474_p8, 1, 0 }
  0x17   : > { %2847 = sst [smem:[#allocation18_spill]] %s2846_s20  ;;  %s293_s23 = sshll.u32 %s2368_s22, 4  ;;  %s2478_s23 = int_to_ptr.vmem [resolvable:$true] %s293_s23 }
  0x18   : > { %p2057_p9 = pneg %p2474_p8  ;;  %s2369_s25 = smov [#allocation8]  }
  0x19   : > { %s309_s26 = sshll.u32 %s2369_s25, 4  ;;  %s2370_s27 = smov [#allocation10]   ;;  %s2489_s26 = int_to_ptr.vmem [resolvable:$true] %s309_s26 }
  0x1a   : > { %p2485_p11 = pnand %p2057_p9, %p2832_p1  ;;  %s2491_s28 = sshll.u32 %s2370_s27, 4  ;;  %s326_s28 = int_to_ptr.vmem [resolvable:$true] %s2491_s28 }
  0x1b   : > { %s2850_s2 = sld [smem:[#allocation19_spill]] }
  0x1c   : > { %p2501_p13 = pneg %p2485_p11 }
  0x21   : > { %s2144_s11 = scalar_lea.hbm %s2850_s2, 512 }
  0x22   : > { %p2145_p12 = scmp.ne.s32.totalorder %s2850_s2, %s2144_s11  ;;  %p2151_p5 = scmp.lt.u32.totalorder %s2144_s11, %s2850_s2 }
  0x24   : > { %p2147_p0 = pnand %p2501_p13, %p2145_p12 }
  0x26   : > { %p2148_p3 = pneg %p2147_p0 }
  0x28   : > { %p2153_p7 = pnand %p2151_p5, %p2148_p3 }
  0x2a   : > { %2156 = shalt.err (!%p2153_p7)
}
  0x2b   : > { %s2157_s29 = scalar_lea.vmem %s2478_s23, 512  ;;  %p2165_p2 = scmp.lt.s32.totalorder %s2478_s23, %s2478_s23 }
  0x2c   : > { %p2158_p9 = scmp.ne.s32.totalorder %s2478_s23, %s2157_s29  ;;  %p2166_p6 = scmp.lt.s32.totalorder %s2157_s29, %s2157_s29 }
  0x2e   : > { %p2160_p10 = pnand %p2158_p9, %p2501_p13  ;;  %p2167_p12 = por %p2166_p6, %p2165_p2 }
  0x30   : > { %p2161_p1 = pneg %p2160_p10 }
  0x32   : > { %p2168_p0 = pnand %p2167_p12, %p2161_p1 }
  0x34   : > { %2171 = shalt.err (!%p2168_p0)
}
  0x35   : > { %s2371_s30 = smov 128   ;;  %s2372_s11 = smov 8  }
  0x36   : > { %2060 = dma.hbm_to_vmem [thread:$0]  (!%p2485_p11), %s2850_s2, 512, %s2478_s23, [#allocation6], %s2371_s30, %s2371_s30, %s2372_s11  }
  0x37   : > { %s2852_s4 = sld [smem:[#allocation20_spill]] }
  0x3d   : > { %s2172_s29 = scalar_lea.hbm %s2852_s4, 512 }
  0x3e   : > { %p2173_p1 = scmp.ne.s32.totalorder %s2852_s4, %s2172_s29  ;;  %p2179_p10 = scmp.lt.u32.totalorder %s2172_s29, %s2852_s4 }
  0x40   : > { %p2175_p2 = pnand %p2173_p1, %p2501_p13 }
  0x42   : > { %p2176_p6 = pneg %p2175_p2 }
  0x44   : > { %p2181_p3 = pnand %p2179_p10, %p2176_p6 }
  0x46   : > { %2184 = shalt.err (!%p2181_p3)
}
  0x47   : > { %s2185_s23 = scalar_lea.vmem %s2489_s26, 512  ;;  %p2193_p12 = scmp.lt.s32.totalorder %s2489_s26, %s2489_s26 }
  0x48   : > { %p2186_p5 = scmp.ne.s32.totalorder %s2489_s26, %s2185_s23  ;;  %p2194_p0 = scmp.lt.s32.totalorder %s2185_s23, %s2185_s23 }
  0x4a   : > { %p2188_p7 = pnand %p2186_p5, %p2501_p13  ;;  %p2195_p1 = por %p2194_p0, %p2193_p12 }
  0x4c   : > { %p2189_p9 = pneg %p2188_p7 }
  0x4e   : > { %p2196_p2 = pnand %p2195_p1, %p2189_p9 }
  0x50   : > { %2199 = shalt.err (!%p2196_p2)
}
  0x51   : > { %2063 = dma.hbm_to_vmem [thread:$0]  (!%p2485_p11), %s2852_s4, 512, %s2489_s26, [#allocation9], %s2371_s30, %s2371_s30, %s2372_s11  }
  0x52   : > { %s2853_s6 = sld [smem:[#allocation21_spill]] }
  0x58   : > { %s2200_s12 = scalar_lea.hbm %s2853_s6, 512 }
  0x59   : > { %p2201_p6 = scmp.ne.s32.totalorder %s2853_s6, %s2200_s12  ;;  %p2207_p5 = scmp.lt.u32.totalorder %s2200_s12, %s2853_s6 }
  0x5b   : > { %p2203_p10 = pnand %p2201_p6, %p2501_p13 }
  0x5d   : > { %p2204_p3 = pneg %p2203_p10 }
  0x5f   : > { %p2209_p7 = pnand %p2207_p5, %p2204_p3 }
  0x61   : > { %2212 = shalt.err (!%p2209_p7)
}
  0x62   : > { %s2213_s23 = scalar_lea.vmem %s326_s28, 512  ;;  %p2221_p1 = scmp.lt.s32.totalorder %s326_s28, %s326_s28 }
  0x63   : > { %p2214_p9 = scmp.ne.s32.totalorder %s326_s28, %s2213_s23  ;;  %p2222_p2 = scmp.lt.s32.totalorder %s2213_s23, %s2213_s23 }
  0x65   : > { %p2216_p12 = pnand %p2214_p9, %p2501_p13  ;;  %p2223_p4 = por %p2222_p2, %p2221_p1 }
  0x67   : > { %p2217_p0 = pneg %p2216_p12 }
  0x69   : > { %p2224_p8 = pnand %p2223_p4, %p2217_p0 }
  0x6b   : > { %2227 = shalt.err (!%p2224_p8)
}
  0x6c   : > { %2066 = dma.hbm_to_vmem [thread:$0]  (!%p2485_p11), %s2853_s6, 512, %s326_s28, [#allocation9], %s2371_s30, %s2371_s30, %s2372_s11  }
  0x6d   : > { %s2574_s22 = sadd.s32 1, %s2366_s16   ;;  %s37_s10 = sadd.s32 1, %s2362_s15 }
  0x6e   : > { %s34_s24 = ssub.s32 %s2366_s16, %s2574_s22  ;;  %p44_p8 = scmp.ne.s32.totalorder %s2362_s15, %s2358_s14 }
  0x6f   : > { %p35_p4 = scmp.eq.s32.totalorder %s34_s24, 0  ;;  %p45_p13 = scmp.eq.s32.totalorder %s2366_s16, 0 }
  0x70   : > { %p2081_p6 = scmp.lt.s32.totalorder %s2366_s16, 2  ;;  %p2854_p3 = scmp.eq.s32.totalorder %s2455_s17, 1 }
  0x71   : > { %s2584_s13 = scalar_select %p35_p4, %s2362_s15, %s37_s10  }
  0x72   : > { %p46_p10 = por %p45_p13, %p44_p8  ;;  %p2588_p5 = por %p2854_p3, %p44_p8 }
  0x73   : > { %s348_s12 = sand.u32 1, %s2362_s15   ;;  %s1883_s18 = sshll.u32 %s2366_s16, 7 }
  0x74   : > { %s2855_s20 = scalar_select %p2588_p5, 1, 0 }
  0x75   : > { %s2594_s28 = sshll.u32 %s348_s12, 3  ;;  %s2599_s25 = scalar_lea.hbm %s2821_s0, %s1883_s18 }
  0x76   : > { %s352_s27 = scalar_lea.vmem [#allocation2], %s2594_s28  ;;  %p2602_p11 = pnand %p2081_p6, %p46_p10 }
  0x77   : > { %s359_s29 = sshll.u32 %s352_s27, 4  ;;  %s2611_s24 = scalar_lea.hbm %s2822_s1, %s1883_s18  ;;  %s2606_s29 = int_to_ptr.vmem [resolvable:$true] %s359_s29 }
  0x78   : > { %s349_s10 = scalar_lea.sflag [#allocation3], %s348_s12  ;;  %s2228_s30 = scalar_lea.hbm %s2599_s25, 128 }
  0x79   : > { %p2229_p7 = scmp.ne.s32.totalorder %s2599_s25, %s2228_s30  ;;  %p2230_p9 = pneg %p2602_p11 }
  0x7a   : > { %s2233_s2 = scalar_lea.hbm %s2821_s0, 256  ;;  %p2234_p1 = scmp.lt.u32.totalorder %s2599_s25, %s2821_s0 }
  0x7b   : > { %p2231_p12 = pnand %p2230_p9, %p2229_p7  ;;  %p2235_p2 = scmp.lt.u32.totalorder %s2233_s2, %s2228_s30 }
  0x7c   : > { %p2237_p8 = scmp.lt.u32.totalorder %s2228_s30, %s2599_s25 }
  0x7d   : > { %p2232_p0 = pneg %p2231_p12  ;;  %p2236_p4 = por %p2235_p2, %p2234_p1 }
  0x7f   : > { %p2238_p13 = por %p2237_p8, %p2236_p4 }
  0x81   : > { %p2239_p6 = pnand %p2238_p13, %p2232_p0 }
  0x83   : > { %2242 = shalt.err (!%p2239_p6)
}
  0x84   : > { %s2243_s12 = scalar_lea.vmem %s2606_s29, 128  ;;  %s2373_s18 = smov [#allocation2]  }
  0x85   : > { %p2244_p10 = scmp.ne.s32.totalorder %s2606_s29, %s2243_s12  ;;  %s2248_s26 = sshll.u32 %s2373_s18, 4  ;;  %s2249_s26 = int_to_ptr.vmem [resolvable:$false] %s2248_s26 }
  0x86   : > { %s2250_s4 = scalar_lea.vmem %s2249_s26, 256  ;;  %p2251_p12 = scmp.lt.s32.totalorder %s2606_s29, %s2249_s26 }
  0x87   : > { %p2246_p3 = pnand %p2244_p10, %p2230_p9  ;;  %p2252_p1 = scmp.lt.s32.totalorder %s2250_s4, %s2243_s12 }
  0x89   : > { %p2247_p7 = pneg %p2246_p3  ;;  %p2253_p2 = por %p2252_p1, %p2251_p12 }
  0x8b   : > { %p2254_p4 = pnand %p2253_p2, %p2247_p7 }
  0x8d   : > { %2257 = shalt.err (!%p2254_p4)
}
  0x8e   : > { %2070 = dma.hbm_to_vmem [thread:$0]  (!%p2602_p11), %s2599_s25, 128, %s2606_s29, %s349_s10  }
  0x8f   : > { %s366_s2 = sand.u32 1, %s2366_s16   ;;  %s370_s6 = scalar_lea.vmem [#allocation5], %s2594_s28 }
  0x90   : > { %s377_s9 = sshll.u32 %s370_s6, 4  ;;  %s367_s30 = scalar_lea.sflag [#allocation6], %s366_s2  ;;  %s378_s9 = int_to_ptr.vmem [resolvable:$true] %s377_s9 }
  0x91   : > { %s2258_s11 = scalar_lea.hbm %s2611_s24, 128  ;;  %s2263_s18 = scalar_lea.hbm %s2822_s1, 256 }
  0x92   : > { %p2259_p0 = scmp.ne.s32.totalorder %s2611_s24, %s2258_s11  ;;  %p2264_p6 = scmp.lt.u32.totalorder %s2611_s24, %s2822_s1 }
  0x93   : > { %p2265_p10 = scmp.lt.u32.totalorder %s2263_s18, %s2258_s11  ;;  %p2267_p7 = scmp.lt.u32.totalorder %s2258_s11, %s2611_s24 }
  0x94   : > { %p2261_p8 = pnand %p2259_p0, %p2230_p9 }
  0x95   : > { %p2266_p3 = por %p2265_p10, %p2264_p6 }
  0x96   : > { %p2262_p13 = pneg %p2261_p8 }
  0x97   : > { %p2268_p12 = por %p2267_p7, %p2266_p3 }
  0x99   : > { %p2269_p1 = pnand %p2268_p12, %p2262_p13 }
  0x9b   : > { %2272 = shalt.err (!%p2269_p1)
}
  0x9c   : > { %s2273_s28 = scalar_lea.vmem %s378_s9, 128  ;;  %s2374_s25 = smov [#allocation5]  }
  0x9d   : > { %p2274_p2 = scmp.ne.s32.totalorder %s378_s9, %s2273_s28  ;;  %s2278_s29 = sshll.u32 %s2374_s25, 4  ;;  %s2279_s29 = int_to_ptr.vmem [resolvable:$false] %s2278_s29 }
  0x9e   : > { %s2280_s10 = scalar_lea.vmem %s2279_s29, 256  ;;  %p2281_p8 = scmp.lt.s32.totalorder %s378_s9, %s2279_s29 }
  0x9f   : > { %p2276_p4 = pnand %p2274_p2, %p2230_p9  ;;  %p2282_p5 = scmp.lt.s32.totalorder %s2280_s10, %s2273_s28 }
  0xa1   : > { %p2277_p0 = pneg %p2276_p4  ;;  %p2283_p6 = por %p2282_p5, %p2281_p8 }
  0xa3   : > { %p2284_p10 = pnand %p2283_p6, %p2277_p0 }
  0xa5   : > { %2287 = shalt.err (!%p2284_p10)
}
  0xa6   : > { %2073 = dma.hbm_to_vmem [thread:$0]  (!%p2602_p11), %s2611_s24, 128, %s378_s9, %s367_s30  }
  0xa7   : > { %p2857_p13 = scmp.ne.s32.totalorder %s2848_s21, 0 }
  0xa8   : > { %s2662_s2 = sand.u32 (!%p2857_p13), 1, %s2358_s14   ;;  %p2858_p5 = scmp.ne.s32.totalorder (!%p2857_p13), %s2845_s19, 0 }
  0xa9   : > { %386 = sbr.rel (%p2857_p13) target bundleno = 2250 (0x8ca), region = 60  ;;  %s2665_s6 = sshll.u32 (!%p2857_p13), %s2662_s2, 3 }
  0xaa   : > { %s389_s11 = scalar_lea.sflag (!%p2857_p13), [#allocation3], %s2662_s2  ;;  %s392_s27 = scalar_lea.vmem (!%p2857_p13), [#allocation2], %s2665_s6 }
  0xb0   : > { %2333 = dma.done.wait (%p2858_p5), %s389_s11, 128  }
  0xb1   : > { %2335 = vsyncadd (%p2858_p5), %s389_s11, 4294967168  ;;  %s397_s21 = sand.u32 1, %s2455_s17   ;;  %s401_s24 = scalar_lea.vmem [#allocation5], %s2665_s6 }
  0xb2   : > { %s398_s23 = scalar_lea.sflag [#allocation6], %s397_s21 }
  0xb3   : > { %2337 = dma.done.wait (%p2858_p5), %s398_s23, 128  }
  0xb4   : > { %2339 = vsyncadd (%p2858_p5), %s398_s23, 4294967168  ;;  %p2859_p11 = scmp.eq.s32.totalorder %s2455_s17, 0 }
  0xb6   : > { %2341 = dma.done.wait (%p2859_p11), [#allocation6], 512   ;;  %p2860_p9 = pmov %p2859_p11 }
  0xb8   : > { %2343 = vsyncadd (%p2860_p9), [#allocation6], 4294966784  ;;  %p2861_p3 = pmov %p2860_p9 }
  0xba   : > { %2345 = dma.done.wait (%p2861_p3), [#allocation9], 1024   ;;  %p2862_p7 = pmov %p2861_p3 }
  0xbb   : > { %v2375_v0 = vmov 0.0|0.0   ;;  %vm2376_vm0 = vmmov 0   ;;  %v2377_v1 = vmov 0.0   ;;  %v458_v2 = vld [vmem:[#allocation7] sm:$0xff]  ;;  %v459_v3 = vld [vmem:[#allocation7 + $0x8] sm:$0xff]  ;;  %v460_v4 = vld [vmem:[#allocation7 + $0x10] sm:$0xff] }
  0xbc   : > { %2347 = vsyncadd (%p2862_p7), [#allocation9], 4294966272  ;;  %2021 = vmatprep.subr.bf16.mxu0 %v2375_v0  ;;  %1956 = vmatprep.mubr.msk.f32.mxu0 %vm2376_vm0, %v2377_v1  ;;  %v2022_v5 = vpack.c.bf16 %v459_v3, %v458_v2  ;;  %v461_v6 = vld [vmem:[#allocation7 + $0x18] sm:$0xff]  ;;  %v2693_v8 = vld [vmem:[%s392_s27] sm:$0xff]  ;;  %vm469_vm1 = vcmask 261120   ;;  %vm819_vm2 = vcmask 64512  }
  0xbd   : > { %2027 = vmatprep.subr.bf16.mxu1 %v2375_v0  ;;  %1967 = vmatprep.mubr.msk.f32.mxu1 %vm2376_vm0, %v2377_v1  ;;  %v2025_v7 = vpack.c.bf16 %v461_v6, %v460_v4  ;;  %v456_v9 = vld [vmem:[%s401_s24] sm:$0xff]  ;;  %v1893_v11 = vld [vmem:[%s2824_s3] ss:$0 sm:$0xff]  ;;  %v544_v16 = vld [vmem:[#allocation8 + $0x8] sm:$0xff]  ;;  %s2863_s10 = sld [smem:[#allocation22_spill]]  ;;  %s1914_s11 = sshll.u32 %s2455_s17, 7 }
  0xbe   : > { %2023 = vmatpush3.bf16.msra.mxu0 %v2022_v5  ;;  %v457_v10 = vadd.f32 %v456_v9, %v2693_v8  ;;  %v543_v15 = vld [vmem:[#allocation8] sm:$0xff]  ;;  %v545_v17 = vld [vmem:[#allocation8 + $0x10] sm:$0xff]  ;;  %v546_v19 = vld [vmem:[#allocation8 + $0x18] sm:$0xff]  ;;  %s454_s27 = scalar_lea.vmem [#allocation11], %s2665_s6  ;;  %s2864_s19 = sld [smem:[#allocation23_spill]] }
  0xbf   : > { %2024 = vmatprep.subr.bf16.mxu0 %v2375_v0  ;;  %v2028_v18 = vpack.c.bf16 %v544_v16, %v543_v15  ;;  %v2031_v20 = vpack.c.bf16 %v546_v19, %v545_v17  ;;  %s1755_s21 = sshll.u32 %s454_s27, 4  ;;  %s1742_s30 = scalar_lea.sflag [#allocation4], %s2662_s2  ;;  %s2778_s21 = int_to_ptr.vmem [resolvable:$true] %s1755_s21 }
  0xc0   : > { %s2288_s12 = scalar_lea.vmem %s2778_s21, 128  ;;  %p2865_p1 = scmp.ne.s32.totalorder %s2855_s20, 0 }
  0xc1   : > { %2029 = vmatpush3.bf16.msra.mxu1 %v2028_v18  ;;  %p2289_p12 = scmp.ne.s32.totalorder %s2778_s21, %s2288_s12  ;;  %s2378_s17 = smov [#allocation11]  }
  0xc2   : > { %2026 = vmatpush3.bf16.msra.mxu0 %v2025_v7  ;;  %2030 = vmatprep.subr.bf16.mxu1 %v2375_v0  ;;  %s2292_s6 = sshll.u32 %s2378_s17, 4  ;;  %s2293_s6 = int_to_ptr.vmem [resolvable:$false] %s2292_s6 }
  0xc3   : > { %1980 = vmatprep.subr.mxu0 %v2377_v1  ;;  %p2290_p2 = pnand %p2289_p12, %p2865_p1  ;;  %s2294_s18 = scalar_lea.vmem %s2293_s6, 256 }
  0xc4   : > { %s2776_s9 = scalar_lea.hbm %s2864_s19, %s1914_s11  ;;  %p2295_p0 = scmp.lt.s32.totalorder %s2778_s21, %s2293_s6 }
  0xc5   : > { %1957 = vmatmul.mubr.msk.f32.vlgmr.msra.gmra.mrb[0].mxu0 %vm469_vm1, %v457_v10  ;;  %2032 = vmatpush3.bf16.msra.mxu1 %v2031_v20  ;;  %v1895_v10 = vld [vmem:[%s2826_s5] ss:$0 sm:$0xff]  ;;  %p2291_p4 = pneg %p2290_p2  ;;  %p2296_p8 = scmp.lt.s32.totalorder %s2294_s18, %s2288_s12 }
  0xc6   : > { %1982 = vmatprep.mubr.msk.f32.mxu0 %vm2376_vm0, %v2377_v1  ;;  %1970 = vmatprep.subr.mxu1 %v2377_v1 }
  0xc7   : > { %p2297_p6 = por %p2296_p8, %p2295_p0 }
  0xc8   : > { %1968 = vmatmul.mubr.msk.f32.vlgmr.msra.gmra.mrb[0].mxu1 %vm469_vm1, %v2693_v8 }
  0xc9   : > { %1972 = vmatprep.mubr.msk.f32.mxu1 %vm2376_vm0, %v2377_v1  ;;  %p2298_p10 = pnand %p2297_p6, %p2291_p4 }
 0x198   : > { %v539_v12 = vpop.f32.mrb[0].mxu0 }
 0x199   : > { %v1958_v13 = vpop.f32.mrb[1].mxu0  ;;  %v540_v14 = vadd.f32 %v1893_v11, %v539_v12 }
 0x19b   : > { %627 = vxpose.xlu0.b32.start.end [1/1] (short) (narrow) %v540_v14, 64  ;;  %v2712_v28 = vpop.f32.mrb[0].mxu1 }
 0x19c   : > { %v1969_v29 = vpop.f32.mrb[1].mxu1  ;;  %v624_v11 = vadd.f32 %v1895_v10, %v2712_v28 }
 0x21b   : > { %v643_v21 = vpop.trf.xlu0 }
 0x21c   : > { %691 = vxpose.xlu0.b32.start.end [1/1] (short) (narrow) %v643_v21, 8 }
 0x21f   : > { %v644_v22 = vpop.trf.xlu0 }
 0x220   : > { %723 = vxpose.xlu1.b32.start.end [1/1] (short) (narrow) %v644_v22, 8 }
 0x223   : > { %v645_v23 = vpop.trf.xlu0 }
 0x224   : > { %755 = vxpose.xlu1.b32.start.end [1/1] (short) (narrow) %v645_v23, 8 }
 0x227   : > { %v646_v24 = vpop.trf.xlu0 }
 0x228   : > { %787 = vxpose.xlu1.b32.start.end [1/1] (short) (narrow) %v646_v24, 8 }
 0x22b   : > { %v647_v25 = vpop.trf.xlu0 }
 0x22c   : > { %1971 = vmatpush3.msra.mxu1 %v647_v25 }
 0x22d   : > { %1975 = vmatprep.subr.mxu1 %v2377_v1 }
 0x22f   : > { %v648_v26 = vpop.trf.xlu0 }
 0x233   : > { %v649_v27 = vpop.trf.xlu0 }
 0x234   : > { %1981 = vmatpush3.msra.mxu0 %v649_v27 }
 0x235   : > { %1990 = vmatprep.subr.mxu0 %v2377_v1 }
 0x237   : > { %v650_v30 = vpop.trf.xlu0 }
 0x29c   : > { %v707_v31 = vpop.trf.xlu0 }
 0x29d   : > { %1973 = vmatmul.mubr.msk.f32.vlgmr.msra.gmra.mrb[2].mxu1 %vm819_vm2, %v707_v31 }
 0x29e   : > { %1976 = vmatpush3.msra.mxu1 %v648_v26  ;;  %1977 = vmatprep.mubr.msk.f32.mxu1 %vm2376_vm0, %v2377_v1 }
 0x29f   : > { %1985 = vmatprep.subr.mxu1 %v2377_v1 }
 0x2a0   : > { %v739_v32 = vpop.trf.xlu1 }
 0x2a1   : > { %1978 = vmatmul.mubr.msk.f32.vlgmr.msra.gmra.mrb[4].mxu1 %vm819_vm2, %v739_v32 }
 0x2a2   : > { %1986 = vmatpush3.msra.mxu1 %v650_v30  ;;  %1987 = vmatprep.mubr.msk.f32.mxu1 %vm2376_vm0, %v2377_v1 }
 0x2a3   : > { %1995 = vmatprep.subr.mxu1 %v2377_v1 }
 0x2a4   : > { %v771_v33 = vpop.trf.xlu1 }
 0x2a5   : > { %1983 = vmatmul.mubr.msk.f32.vlgmr.msra.gmra.mrb[2].mxu0 %vm819_vm2, %v771_v33 }
 0x2a6   : > { %1992 = vmatprep.mubr.msk.f32.mxu0 %vm2376_vm0, %v2377_v1 }
 0x2a8   : > { %v803_v34 = vpop.trf.xlu1 }
 0x2a9   : > { %1988 = vmatmul.mubr.msk.f32.vlgmr.msra.gmra.mrb[6].mxu1 %vm819_vm2, %v803_v34 }
 0x2aa   : > { %1997 = vmatprep.mubr.msk.f32.mxu1 %vm2376_vm0, %v2377_v1 }
 0x370   : > { %v889_v35 = vpop.f32.mrb[2].mxu1 }
 0x371   : > { %v1112_v36 = vmul.f32 0.35355338, %v889_v35  ;;  %v1974_v37 = vpop.f32.mrb[3].mxu1 }
 0x372   : > { %v1625_v37 = vld [vmem:[#allocation10 + $0x8] sm:$0xff] }
 0x373   : > { %v1116_v38 = vsel %vm819_vm2, %v1112_v36, -inf }
 0x374   : > { %1117 = vmax.xlane.f32.xlu1 %v1116_v38  ;;  %v962_v39 = vpop.f32.mrb[4].mxu1  ;;  %v1626_v38 = vld [vmem:[#allocation10 + $0x10] sm:$0xff] }
 0x375   : > { %v1113_v40 = vmul.f32 0.35355338, %v962_v39  ;;  %v1979_v41 = vpop.f32.mrb[5].mxu1 }
 0x377   : > { %v1119_v42 = vsel %vm819_vm2, %v1113_v40, -inf }
 0x378   : > { %1120 = vmax.xlane.f32.xlu0 %v1119_v42  ;;  %v1035_v43 = vpop.f32.mrb[2].mxu0 }
 0x379   : > { %v1114_v44 = vmul.f32 0.35355338, %v1035_v43  ;;  %v1984_v45 = vpop.f32.mrb[3].mxu0 }
 0x37b   : > { %v1122_v46 = vsel %vm819_vm2, %v1114_v44, -inf }
 0x37c   : > { %v1108_v47 = vpop.f32.mrb[6].mxu1  ;;  %1123 = vmax.xlane.f32.xlu1 %v1122_v46 }
 0x37d   : > { %v1115_v48 = vmul.f32 0.35355338, %v1108_v47  ;;  %v1989_v49 = vpop.f32.mrb[7].mxu1  ;;  %v1910_v47 = vld [vmem:[%s2828_s7] ss:$0 sm:$0xff] }
 0x37f   : > { %v1125_v50 = vsel %vm819_vm2, %v1115_v48, -inf }
 0x380   : > { %1126 = vmax.xlane.f32.xlu1 %v1125_v50 }
 0x401   : > { %v1118_v51 = vpop.xlane.xlu1 %1117 }
 0x402   : > { %v1128_v52 = vsub.f32 %v1112_v36, %v1118_v51  ;;  %v1624_v36 = vld [vmem:[#allocation10] sm:$0xff] }
 0x403   : > { %v2034_v39 = vpack.c.bf16 %v1625_v37, %v1624_v36 }
 0x404   : > { %v1132_v53 = vmul.f32 1.442695, %v1128_v52 }
 0x405   : > { %v1121_v54 = vpop.xlane.xlu0 %1120 }
 0x406   : > { %2126 = vpow2.f32 %v1132_v53  ;;  %v1129_v55 = vsub.f32 %v1113_v40, %v1121_v54 }
 0x408   : > { %v1134_v56 = vmul.f32 1.442695, %v1129_v55 }
 0x409   : > { %v1124_v57 = vpop.xlane.xlu1 %1123 }
 0x40a   : > { %2128 = vpow2.f32 %v1134_v56  ;;  %v1130_v58 = vsub.f32 %v1114_v44, %v1124_v57 }
 0x40c   : > { %v1136_v59 = vmul.f32 1.442695, %v1130_v58 }
 0x40d   : > { %v1127_v60 = vpop.xlane.xlu1 %1126 }
 0x40e   : > { %2130 = vpow2.f32 %v1136_v59  ;;  %v1131_v61 = vsub.f32 %v1115_v48, %v1127_v60  ;;  %v1911_v59 = vld [vmem:[%s2829_s8] ss:$0 sm:$0xff] }
 0x410   : > { %v2127_v62 = vpop.eup %2126  ;;  %v1138_v63 = vmul.f32 1.442695, %v1131_v61  ;;  %v1912_v61 = vld [vmem:[%s2863_s10] ss:$0 sm:$0xff] }
 0x411   : > { %v1140_v2 = vsel %vm819_vm2, %v2127_v62, 0.0 }
 0x412   : > { %2132 = vpow2.f32 %v1138_v63  ;;  %1141 = vadd.xlane.f32.xlu1 %v1140_v2 }
 0x414   : > { %v2129_v3 = vpop.eup %2128 }
 0x415   : > { %v1143_v4 = vsel %vm819_vm2, %v2129_v3, 0.0 }
 0x416   : > { %1144 = vadd.xlane.f32.xlu1 %v1143_v4 }
 0x418   : > { %v2131_v5 = vpop.eup %2130 }
 0x419   : > { %v1146_v6 = vsel %vm819_vm2, %v2131_v5, 0.0 }
 0x41a   : > { %1147 = vadd.xlane.f32.xlu1 %v1146_v6 }
 0x41c   : > { %v2133_v7 = vpop.eup %2132 }
 0x41d   : > { %v1149_v9 = vsel %vm819_vm2, %v2133_v7, 0.0 }
 0x41e   : > { %1150 = vadd.xlane.f32.xlu1 %v1149_v9 }
 0x451   : > { %659 = vxpose.xlu1.b32.start.end [1/1] (short) (narrow) %v624_v11, 32 }
 0x49f   : > { %v1142_v12 = vpop.xlane.xlu1 %1141 }
 0x4a0   : > { %2134 = vrcp.f32 %v1142_v12 }
 0x4a3   : > { %v1145_v13 = vpop.xlane.xlu1 %1144 }
 0x4a4   : > { %2136 = vrcp.f32 %v1145_v13 }
 0x4a7   : > { %v1148_v14 = vpop.xlane.xlu1 %1147 }
 0x4a8   : > { %2138 = vrcp.f32 %v1148_v14 }
 0x4aa   : > { %v2135_v16 = vpop.eup %2134 }
 0x4ab   : > { %v1151_v15 = vpop.xlane.xlu1 %1150  ;;  %v1156_v18 = vmul.f32 %v2135_v16, %v2127_v62 }
 0x4ac   : > { %2140 = vrcp.f32 %v1151_v15 }
 0x4ae   : > { %v2137_v19 = vpop.eup %2136 }
 0x4af   : > { %v1157_v21 = vmul.f32 %v2137_v19, %v2129_v3 }
 0x4b2   : > { %v2139_v22 = vpop.eup %2138 }
 0x4b3   : > { %v1158_v24 = vmul.f32 %v2139_v22, %v2131_v5 }
 0x4b6   : > { %v2141_v25 = vpop.eup %2140 }
 0x4b7   : > { %v1159_v27 = vmul.f32 %v2141_v25, %v2133_v7 }
 0x4d1   : > { %v675_v17 = vpop.trf.xlu1 }
 0x4d2   : > { %1991 = vmatpush3.xpose.msk.msra.mxu0 %vm819_vm2, %v675_v17 }
 0x4d3   : > { %2000 = vmatprep.subr.mxu0 %v2377_v1 }
 0x4d5   : > { %1993 = vmatmul.mubr.msk.f32.vlgmr.msra.gmra.mrb[4].mxu0 %vm819_vm2, %v1156_v18  ;;  %v676_v20 = vpop.trf.xlu1 }
 0x4d6   : > { %1996 = vmatpush3.xpose.msk.msra.mxu1 %vm819_vm2, %v676_v20  ;;  %2002 = vmatprep.mubr.msk.f32.mxu0 %vm2376_vm0, %v2377_v1 }
 0x4d7   : > { %2005 = vmatprep.subr.mxu1 %v2377_v1 }
 0x4d9   : > { %1998 = vmatmul.mubr.msk.f32.vlgmr.msra.gmra.mrb[8].mxu1 %vm819_vm2, %v1157_v21  ;;  %v677_v23 = vpop.trf.xlu1 }
 0x4da   : > { %2001 = vmatpush3.xpose.msk.msra.mxu0 %vm819_vm2, %v677_v23  ;;  %2007 = vmatprep.mubr.msk.f32.mxu1 %vm2376_vm0, %v2377_v1 }
 0x4db   : > { %2033 = vmatprep.subr.bf16.mxu0 %v2375_v0 }
 0x4dd   : > { %2003 = vmatmul.mubr.msk.f32.vlgmr.msra.gmra.mrb[6].mxu0 %vm819_vm2, %v1158_v24  ;;  %v678_v26 = vpop.trf.xlu1 }
 0x4de   : > { %2006 = vmatpush3.xpose.msk.msra.mxu1 %vm819_vm2, %v678_v26  ;;  %2018 = vmatprep.mubr.msk.f32.mxu0 %vm2376_vm0, %v2377_v1  ;;  %v1627_v1 = vld [vmem:[#allocation10 + $0x18] sm:$0xff] }
 0x4df   : > { %2035 = vmatpush3.bf16.msra.mxu0 %v2034_v39  ;;  %v2037_v40 = vpack.c.bf16 %v1627_v1, %v1626_v38 }
 0x4e0   : > { %2036 = vmatprep.subr.bf16.mxu0 %v2375_v0 }
 0x4e1   : > { %2008 = vmatmul.mubr.msk.f32.vlgmr.msra.gmra.mrb[10].mxu1 %vm819_vm2, %v1159_v27 }
 0x4e3   : > { %2038 = vmatpush3.bf16.msra.mxu0 %v2037_v40 }
 0x5a8   : > { %v1232_v28 = vpop.f32.mrb[4].mxu0 }
 0x5a9   : > { %1464 = vxpose.xlu0.b32.start.end [1/1] (short) (narrow) %v1232_v28, 8  ;;  %v1994_v29 = vpop.f32.mrb[5].mxu0 }
 0x5ac   : > { %v1308_v30 = vpop.f32.mrb[8].mxu1 }
 0x5ad   : > { %v1999_v31 = vpop.f32.mrb[9].mxu1  ;;  %1496 = vxpose.xlu0.b32.start.end [1/1] (short) (narrow) %v1308_v30, 8 }
 0x5b0   : > { %v1384_v32 = vpop.f32.mrb[6].mxu0 }
 0x5b1   : > { %1528 = vxpose.xlu1.b32.start.end [1/1] (short) (narrow) %v1384_v32, 8  ;;  %v2004_v33 = vpop.f32.mrb[7].mxu0 }
 0x5b4   : > { %v1460_v34 = vpop.f32.mrb[10].mxu1 }
 0x5b5   : > { %v2009_v35 = vpop.f32.mrb[11].mxu1  ;;  %1560 = vxpose.xlu0.b32.start.end [1/1] (short) (narrow) %v1460_v34, 8 }
 0x629   : > { %v1480_v41 = vpop.trf.xlu0 }
 0x62a   : > { %1592 = vxpose.xlu0.b32.start [1/4] (short) (narrow) %v1480_v41, 8 }
 0x62d   : > { %v1512_v42 = vpop.trf.xlu0 }
 0x62e   : > { %1593 = vxpose.xlu0.b32.cont [2/4] (short) (narrow) %v1512_v42, 8 }
 0x631   : > { %v1544_v43 = vpop.trf.xlu1 }
 0x632   : > { %1594 = vxpose.xlu0.b32.cont [3/4] (short) (narrow) %v1544_v43, 8 }
 0x635   : > { %v1576_v44 = vpop.trf.xlu0 }
 0x636   : > { %1595 = vxpose.xlu0.b32.end [4/4] (short) (narrow) %v1576_v44, 8 }
 0x6aa   : > { %v1608_v45 = vpop.trf.xlu0 }
 0x6ab   : > { %2019 = vmatmul.mubr.msk.f32.vlgmr.msra.gmra.mrb[8].mxu0 %vm469_vm1, %v1608_v45 }
 0x77e   : > { %v1697_v46 = vpop.f32.mrb[8].mxu0 }
 0x77f   : > { %v1701_v48 = vadd.f32 %v1697_v46, %v2693_v8  ;;  %v2020_v0 = vpop.f32.mrb[9].mxu0 }
 0x781   : > { %v1709_v49 = vadd.f32 %v1910_v47, %v1701_v48 }
 0x783   : > { %v1710_v50 = vsel %vm469_vm1, %v1709_v49, 0.0 }
 0x784   : > { %1711 = vadd.xlane.f32.xlu1 %v1710_v50 }
 0x811   : > { %v1712_v51 = vpop.xlane.xlu1 %1711 }
 0x812   : > { %v1714_v52 = vmul.f32 0.03125, %v1712_v51 }
 0x814   : > { %v1715_v53 = vsub.f32 %v1709_v49, %v1714_v52 }
 0x816   : > { %v1716_v54 = vmul.f32 %v1715_v53, %v1715_v53 }
 0x818   : > { %v1717_v55 = vsel %vm469_vm1, %v1716_v54, 0.0 }
 0x819   : > { %1718 = vadd.xlane.f32.xlu0 %v1717_v55 }
 0x8a6   : > { %v1719_v56 = vpop.xlane.xlu0 %1718 }
 0x8a7   : > { %v1720_v57 = vmul.f32 0.03125, %v1719_v56 }
 0x8a9   : > { %v1721_v58 = vadd.f32 1e-05, %v1720_v57 }
 0x8ab   : > { %2142 = vrsqrt.f32 %v1721_v58 }
 0x8b5   : > { %v2143_v8 = vpop.eup %2142 }
 0x8b6   : > { %v1723_v60 = vmul.f32 %v2143_v8, %v1715_v53 }
 0x8b8   : > { %v1731_v62 = vmul.f32 %v1911_v59, %v1723_v60 }
 0x8ba   : > { %v1739_v63 = vadd.f32 %v1912_v61, %v1731_v62 }
 0x8bc   : > { %1740 = vst.msk [vmem:[%s454_s27] sm:$0xff] %vm469_vm1, %v1739_v63 }
 0x8bd   : > { %2301 = shalt.err (!%p2298_p10)
}
 0x8be   : > { %s2302_s2 = scalar_lea.hbm %s2776_s9, 128  ;;  %s2306_s28 = scalar_lea.hbm %s2864_s19, 256 }
 0x8bf   : > { %p2303_p13 = scmp.ne.s32.totalorder %s2776_s9, %s2302_s2  ;;  %p2307_p9 = scmp.lt.u32.totalorder %s2776_s9, %s2864_s19 }
 0x8c0   : > { %p2308_p3 = scmp.lt.u32.totalorder %s2306_s28, %s2302_s2  ;;  %p2310_p12 = scmp.lt.u32.totalorder %s2302_s2, %s2776_s9 }
 0x8c1   : > { %p2304_p5 = pnand %p2303_p13, %p2865_p1 }
 0x8c2   : > { %p2309_p7 = por %p2308_p3, %p2307_p9 }
 0x8c3   : > { %p2305_p11 = pneg %p2304_p5 }
 0x8c4   : > { %p2311_p2 = por %p2310_p12, %p2309_p7 }
 0x8c6   : > { %p2312_p4 = pnand %p2311_p2, %p2305_p11 }
 0x8c8   : > { %2315 = shalt.err (!%p2312_p4)
}
 0x8c9   : > { %2055 = dma.vmem_to_hbm [thread:$0]  (%p2865_p1), %s2778_s21, 128, %s2776_s9, %s1742_s30  }
 0x8ca PF: > { %s2866_s10 = sld [smem:[#allocation17_spill]]  ;;  %s2867_s11 = sld [smem:[#allocation18_spill]] }
 0x8cb   : > { %p2869_p8 = scmp.ge.s32.totalorder %s2366_s16, 2 }
 0x8d0   : > { %s1767_s27 = sand.u32 1, %s2866_s10   ;;  %p2868_p0 = scmp.ne.s32.totalorder %s2867_s11, 0 }
 0x8d1   : > { %s1768_s23 = scalar_lea.sflag [#allocation4], %s1767_s27 }
 0x8d2   : > { %p2075_p6 = pnand %p2869_p8, %p2868_p0 }
 0x8d4   : > { %2349 = dma.done.wait (!%p2075_p6), %s1768_s23, 128  }
 0x8d5   : > { %2351 = vsyncadd (!%p2075_p6), %s1768_s23, 4294967168  ;;  %s2870_s24 = smov %s2584_s13  ;;  %p27_p10 = scmp.ge.s32.totalorder %s2574_s22, 4  }
 0x8d6   : > { %s2871_s13 = smov %s2358_s14  ;;  %s2872_s14 = smov %s2362_s15 }
 0x8d7   : > { %s2873_s15 = smov %s2870_s24  ;;  %s2874_s16 = smov %s2574_s22 }
 0x8d8   :  { %29 = sbr.rel (!%p27_p10) target bundleno = 14 (0xe), region = 130 }
 0x8df   :  { %1773 = vsyncpa [#allocation3], 1 }
 0x8e0   :  { %1775 = vsyncpa [#allocation3 + $0x1], 1 }
 0x8e1   :  { %1776 = vsyncpa [#allocation6], 1 }
 0x8e2   :  { %1778 = vsyncpa [#allocation6 + $0x1], 1 }
 0x8e3   :  { %1779 = vsyncpa [#allocation9], 1 }
 0x8e4   :  { %1780 = vsyncpa [#allocation4], 1 }
 0x8e5   :  { %1782 = vsyncpa [#allocation4 + $0x1], 1 }

</bundles_post_ra>
